<compile_context>
chip_gen: v5e
topology: v5e:2x2
jax: 0.10.0
libtpu: 0.0.40
codegen_flags: <defaults>
</compile_context>

<pallas_src>
import jax
import jax.numpy as jnp
from jax.experimental import pallas as pl
from jax.experimental.pallas import tpu as pltpu

_LANES = 128


def _logreg_kernel(w_ref, b_ref, x_ref, o_ref):
    # w_ref, b_ref: (1, 1) SMEM scalars; x_ref/o_ref: (tile_r, 128) VMEM tiles.
    w = w_ref[0, 0]
    b = b_ref[0, 0]
    z = x_ref[...] * w + b                      # VPU elementwise (in=out=1 linear)
    o_ref[...] = jax.nn.sigmoid(z).astype(o_ref.dtype)


def logistic_regression(x, weight, bias, *, max_tile_rows=1024):
    """x: (N, 1) f32, weight: (1, 1) f32, bias: (1,) f32 -> (N, 1) f32."""
    n, f = x.shape
    assert f == 1 and weight.shape == (1, 1) and bias.shape == (1,)
    dtype = x.dtype

    # ---- lane-dense padded view: (N, 1) -> (padded_rows, 128) ----
    rows = -(-n // _LANES)                       # cdiv(n, 128)
    rows8 = max(8, ((rows + 7) // 8) * 8)        # sublane-aligned row count
    tile_r = min(int(max_tile_rows), rows8)      # both multiples of 8
    num_tiles = -(-rows8 // tile_r)
    padded_rows = tile_r * num_tiles
    padded_n = padded_rows * _LANES

    x_flat = x.reshape(n)
    x2d = jnp.pad(x_flat, (0, padded_n - n)).reshape(padded_rows, _LANES)
    w2d = weight.reshape(1, 1).astype(dtype)
    b2d = bias.reshape(1, 1).astype(dtype)

    out2d = pl.pallas_call(
        _logreg_kernel,
        out_shape=jax.ShapeDtypeStruct((padded_rows, _LANES), dtype),
        grid_spec=pl.GridSpec(
            grid=(num_tiles,),
            in_specs=[
                pl.BlockSpec(memory_space=pltpu.MemorySpace.SMEM),   # weight (1,1)
                pl.BlockSpec(memory_space=pltpu.MemorySpace.SMEM),   # bias   (1,1)
                pl.BlockSpec((tile_r, _LANES), lambda i: (i, 0)),    # x tile
            ],
            out_specs=pl.BlockSpec((tile_r, _LANES), lambda i: (i, 0)),
        ),
        compiler_params=pltpu.CompilerParams(
            dimension_semantics=("parallel",),
        ),
    )(w2d, b2d, x2d)

    # Drop the pad region (sigmoid of padded zeros never reaches the caller).
    return out2d.reshape(padded_n)[:n].reshape(n, 1)


def _reference(x, weight, bias):
    return jax.nn.sigmoid(x @ weight.T + bias)


if __name__ == "__main__":
    key = jax.random.PRNGKey(0)
    kx, kw, kb = jax.random.split(key, 3)

    # nn.Linear(1,1): weight (1,1), bias (1,); mimic torch's U(-1,1) init (fan_in=1).
    weight = jax.random.uniform(kw, (1, 1), minval=-1.0, maxval=1.0, dtype=jnp.float32)
    bias = jax.random.uniform(kb, (1,), minval=-1.0, maxval=1.0, dtype=jnp.float32)

    # Case 1: tiny batch (single tile, exercises tail padding/slicing).
    n1 = 8
    x1 = jax.random.normal(kx, (n1, 1), dtype=jnp.float32)
    out1 = jax.block_until_ready(logistic_regression(x1, weight, bias))
    ref1 = _reference(x1, weight, bias)
    assert out1.shape == (n1, 1)
    assert jnp.allclose(out1, ref1, atol=1e-6, rtol=1e-6)

    # Case 2: multi-tile grid (small data, forced small tile) to exercise pipelining.
    n2 = 2048
    x2 = jax.random.normal(jax.random.PRNGKey(1), (n2, 1), dtype=jnp.float32)
    out2 = jax.block_until_ready(
        logistic_regression(x2, weight, bias, max_tile_rows=8)
    )
    ref2 = _reference(x2, weight, bias)
    assert out2.shape == (n2, 1)
    assert jnp.allclose(out2, ref2, atol=1e-6, rtol=1e-6)

    print("KERNEL_OK")
</pallas_src>

<mosaic_0001>
module attributes {stable_mosaic.version = 11 : i64} {
  func.func @_logreg_kernel(%arg0: i32, %arg1: memref<1x1xf32, #tpu.memory_space<smem>>, %arg2: memref<1x1xf32, #tpu.memory_space<smem>>, %arg3: memref<8x128xf32, #tpu.memory_space<vmem>>, %arg4: memref<8x128xf32, #tpu.memory_space<vmem>>) attributes {dimension_semantics = [#tpu.dimension_semantics<parallel>], iteration_bounds = array<i64: 1>, scalar_prefetch = 0 : i64, scratch_operands = 0 : i64, tpu.core_type = #tpu.core_type<tc>, window_params = [{transform_indices = @transform_0, window_bounds = array<i64: 1, 1>}, {transform_indices = @transform_1, window_bounds = array<i64: 1, 1>}, {transform_indices = @transform_2, window_bounds = array<i64: 8, 128>}, {transform_indices = @transform_3, window_bounds = array<i64: 8, 128>}]} {
    %c0 = arith.constant 0 : index
    %c0_0 = arith.constant 0 : index
    %0 = memref.load %arg1[%c0, %c0_0] : memref<1x1xf32, #tpu.memory_space<smem>>
    %c0_1 = arith.constant 0 : index
    %c0_2 = arith.constant 0 : index
    %1 = memref.load %arg2[%c0_1, %c0_2] : memref<1x1xf32, #tpu.memory_space<smem>>
    %c0_3 = arith.constant 0 : index
    %c0_4 = arith.constant 0 : index
    %2 = vector.load %arg3[%c0_3, %c0_4] : memref<8x128xf32, #tpu.memory_space<vmem>>, vector<8x128xf32>
    %3 = vector.broadcast %0 : f32 to vector<8x128xf32>
    %4 = arith.mulf %2, %3 : vector<8x128xf32>
    %5 = vector.broadcast %1 : f32 to vector<8x128xf32>
    %6 = arith.addf %4, %5 : vector<8x128xf32>
    %7 = arith.negf %6 : vector<8x128xf32>
    %8 = math.exp %7 : vector<8x128xf32>
    %cst = arith.constant 1.000000e+00 : f32
    %9 = vector.broadcast %cst : f32 to vector<8x128xf32>
    %10 = arith.addf %9, %8 : vector<8x128xf32>
    %11 = arith.divf %9, %10 : vector<8x128xf32>
    %c0_5 = arith.constant 0 : index
    %c0_6 = arith.constant 0 : index
    %12 = vector.load %arg4[%c0_5, %c0_6] : memref<8x128xf32, #tpu.memory_space<vmem>>, vector<8x128xf32>
    tpu.vector_store %arg4[%c0_5, %c0_6], %11 {strides = array<i32>} : memref<8x128xf32, #tpu.memory_space<vmem>>, vector<8x128xf32>,
    return
  }
  func.func @transform_0(%arg0: i32) -> (i32, i32) {
    %c0_i32 = arith.constant 0 : i32
    %c0_i32_0 = arith.constant 0 : i32
    %c0_i32_1 = arith.constant 0 : i32
    return %c0_i32, %c0_i32_0 : i32, i32
  }
  func.func @transform_1(%arg0: i32) -> (i32, i32) {
    %c0_i32 = arith.constant 0 : i32
    %c0_i32_0 = arith.constant 0 : i32
    %c0_i32_1 = arith.constant 0 : i32
    return %c0_i32, %c0_i32_0 : i32, i32
  }
  func.func @transform_2(%arg0: i32) -> (i32, i32) {
    %c0_i32 = arith.constant 0 : i32
    %c0_i32_0 = arith.constant 0 : i32
    return %arg0, %c0_i32 : i32, i32
  }
  func.func @transform_3(%arg0: i32) -> (i32, i32) {
    %c0_i32 = arith.constant 0 : i32
    %c0_i32_0 = arith.constant 0 : i32
    return %arg0, %c0_i32 : i32, i32
  }
}

</mosaic_0001>

<bundles_post_ra>
// kernel: tpu_custom_call.1
= control target key start
LH: loop header
LB: loop body
LE: loop exit
PB: predicated region body
PF: predicated region fallthrough
CT: control target
= control target key end

     0   :  { %10 = vsyncpa [#allocation5], 0  ;;  %s168_s0 = inlined_call_operand.<no memory space> [shape: f32[1,1], index: 0, kind: input, shape index: {}]   ;;  %s169_s1 = inlined_call_operand.<no memory space> [shape: f32[1,1], index: 1, kind: input, shape index: {}]   ;;  %s170_s2 = inlined_call_operand.hbm [shape: f32[8,128], index: 2, kind: input, shape index: {}]   ;;  %s171_s3 = inlined_call_operand.hbm [shape: f32[8,128], index: 3, kind: output, shape index: {}]  }
   0x1   :  { %11 = vsyncpa [#allocation6], 0  ;;  %s21_s14 = sshll.u32 %s170_s2, 4  ;;  %s134_s15 = smov [#allocation4]   ;;  %s22_s14 = int_to_ptr.hbm [resolvable:$true] %s21_s14 }
   0x2   :  { %s23_s16 = sshll.u32 %s134_s15, 4  ;;  %s24_s16 = int_to_ptr.vmem [resolvable:$true] %s23_s16 }
   0x3   :  { %26 = dma.hbm_to_vmem [thread:$0]  %s22_s14, 128, %s24_s16, [#allocation5]  }
   0x4   :  { %130 = dma.done.wait [#allocation5], 128  }
   0x5   :  { %131 = vsyncadd [#allocation5], 4294967168  ;;  %v34_v0 = vstv %s168_s0  ;;  %v33_v1 = vld [vmem:[#allocation4] sm:$0xff]  ;;  %v36_v2 = vstv %s169_s1  ;;  %s135_s0 = smov [#allocation7]   ;;  %s65_s22 = sshll.u32 %s171_s3, 4  ;;  %s66_s22 = int_to_ptr.hbm [resolvable:$true] %s65_s22 }
   0x6   :  { %v35_v3 = vmul.f32 %v34_v0, %v33_v1  ;;  %s63_s2 = sshll.u32 %s135_s0, 4  ;;  %s64_s2 = int_to_ptr.vmem [resolvable:$true] %s63_s2 }
   0x8   :  { %v37_v4 = vadd.f32 %v36_v2, %v35_v3 }
   0xa   :  { %v75_v5 = vmul.f32 -1.442695, %v37_v4 }
   0xc   :  { %78 = vpow2.f32 %v75_v5 }
  0x12   :  { %v79_v6 = vpop.eup %78 }
  0x13   :  { %v41_v7 = vadd.f32 1.0, %v79_v6 }
  0x15   :  { %80 = vrcp.f32 %v41_v7  ;;  %v53_v10 = vand.u32 2147483648, %v41_v7  ;;  %vm47_vm0 = vweird.f32 %v41_v7  ;;  %v51_v12 = vand.u32 2147483647, %v41_v7 }
  0x17   :  { %v54_v14 = vor.u32 1.1754944e-38, %v53_v10  ;;  %vm52_vm3 = vcmp.eq.f32.partialorder %v51_v12, 8.507059e+37 }
  0x1b   :  { %v81_v8 = vpop.eup %80 }
  0x1c   :  { %v43_v9 = vmul.f32 %v81_v8, %v41_v7  ;;  %vm48_vm1 = vweird.f32 %v81_v8 }
  0x1d   :  { %vm49_vm2 = vmor %vm47_vm0, %vm48_vm1 }
  0x1e   :  { %v44_v11 = vsub.f32 1.0, %v43_v9 }
  0x20   :  { %v45_v13 = vmul.f32 %v81_v8, %v44_v11 }
  0x22   :  { %v46_v15 = vadd.f32 %v81_v8, %v45_v13 }
  0x24   :  { %v50_v16 = vsel %vm49_vm2, %v81_v8, %v46_v15 }
  0x25   :  { %v55_v17 = vsel %vm52_vm3, %v54_v14, %v50_v16 }
  0x26   :  { %57 = vst [vmem:[#allocation7] sm:$0xff] %v55_v17 }
  0x27   :  { %68 = dma.vmem_to_hbm [thread:$0]  %s64_s2, 128, %s66_s22, [#allocation6]  }
  0x28   :  { %132 = dma.done.wait [#allocation6], 128  }
  0x29   :  { %133 = vsyncadd [#allocation6], 4294967168 }
  0x2a   :  { %73 = vsyncpa [#allocation5], 1 }
  0x2b   :  { %74 = vsyncpa [#allocation6], 1 }

</bundles_post_ra>
